<compile_context>
chip_gen: v5e
topology: v5e:2x2
jax: 0.10.0
libtpu: 0.0.40
codegen_flags: <defaults>
</compile_context>

<pallas_src>
import functools

import jax
import jax.numpy as jnp
from jax.experimental import pallas as pl
from jax.experimental.pallas import tpu as pltpu

LB_SMOOTH = 0.1
IGNORE_INDEX = -100

_MAX_TILE_LANES = 8192      # lane-width cap per grid step
_MIN_GRID_STEPS = 4         # keep both v7x TensorCores + the DMA pipeline busy


def _vmem_limit_bytes():
    """Generation-aware scoped-VMEM limit (v5e/v6e -> 64 MiB, v7x -> 48 MiB)."""
    try:
        cap = pltpu.get_tpu_info().vmem_capacity_bytes
    except Exception:
        cap = 64 << 20
    return int(min(cap * 3 // 4, 64 << 20))


def _choose_tile(hw, c, itemsize, vmem_limit, n):
    """Lane tile T: dtype-aware VMEM-budgeted, tail-balanced, >= _MIN_GRID_STEPS."""
    # Per-lane VMEM bytes that scale with T: double-buffered input block
    # (2*c*itemsize), f32 upcast + exp + onehot-select temps (~3*c*4),
    # plus the label block and a handful of (1, T) f32 rows.
    per_lane = c * (2 * itemsize + 12) + 64
    t_cap = (vmem_limit // 2) // per_lane
    t_cap = max(128, min(_MAX_TILE_LANES, (t_cap // 128) * 128))
    if hw <= 128:
        return hw                                   # single full-extent block
    cdiv = lambda a, b: -(-a // b)
    # Enough spatial blocks to (a) fit the budget, (b) expose >= _MIN_GRID_STEPS.
    j_blocks = max(cdiv(hw, t_cap), cdiv(_MIN_GRID_STEPS, n))
    if j_blocks == 1:
        return hw                                   # full extent, no padding needed
    # Balance ragged tails: equal-ish blocks rounded up to a 128-lane multiple.
    t = cdiv(cdiv(hw, j_blocks), 128) * 128
    return min(t, t_cap)


def _per_lane_loss(logits_ref, label_ref, lb_pos, lb_neg, ignore_index):
    """Shared body: per-lane (spatial-position) loss and ignore mask."""
    x = logits_ref[0].astype(jnp.float32)                       # (C, T) f32
    c, _ = x.shape

    col_max = jnp.max(x, axis=0, keepdims=True)                 # (1, T)   XLU
    e = jnp.exp(x - col_max)                                    # (C, T)   EUP/VPU

    # Plain class-axis sums on the otherwise-idle MXU.
    ones_row = jnp.ones((1, c), jnp.float32)
    sum_exp = jnp.dot(ones_row, e, preferred_element_type=jnp.float32)  # (1, T)
    sum_x = jnp.dot(ones_row, x, preferred_element_type=jnp.float32)    # (1, T)
    lse = jnp.log(sum_exp)                                      # (1, T)   EUP

    lbl = label_ref[0]                                          # (1, T) int32
    ignore = lbl == ignore_index
    lbl_c = jnp.where(ignore, 0, lbl)                           # label[ignore] = 0

    cls = jax.lax.broadcasted_iota(jnp.int32, (c, 1), 0)        # (C, 1) sublane ids
    onehot = cls == lbl_c                                       # (C, T) bool
    x_true = jnp.sum(jnp.where(onehot, x, 0.0), axis=0, keepdims=True)  # (1, T)

    # log_softmax = (x - col_max) - lse, hence:
    #   sum_c logs = sum_x - c*col_max - c*lse ;  logs[true] = x_true - col_max - lse
    loss = -(lb_neg * (sum_x - c * col_max - c * lse)
             + (lb_pos - lb_neg) * (x_true - col_max - lse))    # (1, T)
    loss = jnp.where(ignore, 0.0, loss)
    return loss, ignore


def _ls_ce_loss_kernel(logits_ref, label_ref, loss_ref, *, lb_pos, lb_neg,
                       ignore_index):
    # reduction='none': lane-dense per-position loss write.
    loss, _ = _per_lane_loss(logits_ref, label_ref, lb_pos, lb_neg, ignore_index)
    loss_ref[0] = loss


def _ls_ce_reduce_kernel(logits_ref, label_ref, psum_ref, pcnt_ref, *, lb_pos,
                         lb_neg, ignore_index, hw):
    # reduction='mean'/'sum': per-grid-step partial loss sum + valid-label count.
    loss, ignore = _per_lane_loss(logits_ref, label_ref, lb_pos, lb_neg,
                                  ignore_index)
    t = loss.shape[-1]
    # Mask ragged-tail lanes (garbage beyond the spatial extent) before summing.
    lane = jax.lax.broadcasted_iota(jnp.int32, (1, t), 1)
    remaining = hw - pl.program_id(1) * t
    keep = jnp.logical_and(lane < remaining, jnp.logical_not(ignore))
    psum_ref[...] = jnp.broadcast_to(jnp.sum(jnp.where(keep, loss, 0.0)),
                                     psum_ref.shape)
    pcnt_ref[...] = jnp.broadcast_to(jnp.sum(jnp.where(keep, 1.0, 0.0)),
                                     pcnt_ref.shape)


def label_smooth_ce(logits, label, lb_smooth=LB_SMOOTH, reduction="mean",
                    ignore_index=IGNORE_INDEX):
    """logits: (N, C, H, W) float (f32 or bf16), label: (N, H, W) int."""
    n, c, h, w = logits.shape
    hw = h * w

    # Free, contiguous views -- no transpose, no pad of the logits tensor.
    x = logits.reshape(n, c, hw)
    y = label.reshape(n, 1, hw).astype(jnp.int32)

    vmem_limit = _vmem_limit_bytes()
    t = _choose_tile(hw, c, jnp.dtype(logits.dtype).itemsize, vmem_limit, n)
    num_j = -(-hw // t)
    grid = (n, num_j)

    lb_pos = 1.0 - lb_smooth
    lb_neg = lb_smooth / c

    in_specs = [
        # TODO(synk): on v5e with f32 inputs, add pipeline_mode=pl.Buffered(3) here
        # if the trace shows exposed per-step DMA.
        pl.BlockSpec((1, c, t), lambda i, j: (i, 0, j)),
        pl.BlockSpec((1, 1, t), lambda i, j: (i, 0, j)),
    ]
    compiler_params = pltpu.CompilerParams(
        dimension_semantics=("parallel", "parallel"),
        vmem_limit_bytes=vmem_limit)

    if reduction in ("mean", "sum"):
        kernel = functools.partial(_ls_ce_reduce_kernel, lb_pos=lb_pos,
                                   lb_neg=lb_neg, ignore_index=ignore_index,
                                   hw=hw)
        psum, pcnt = pl.pallas_call(
            kernel,
            out_shape=(jax.ShapeDtypeStruct((n, num_j, 1, 128), jnp.float32),
                       jax.ShapeDtypeStruct((n, num_j, 1, 128), jnp.float32)),
            grid_spec=pltpu.PrefetchScalarGridSpec(
                num_scalar_prefetch=0,
                grid=grid,
                in_specs=in_specs,
                out_specs=[
                    pl.BlockSpec((1, 1, 1, 128), lambda i, j: (i, j, 0, 0)),
                    pl.BlockSpec((1, 1, 1, 128), lambda i, j: (i, j, 0, 0)),
                ],
            ),
            compiler_params=compiler_params,
        )(x, y)
        total = jnp.sum(psum[..., 0])
        if reduction == "sum":
            return total
        # NOTE: matches PyTorch -- divides by 0 (NaN) if every label is ignore_index.
        n_valid = jnp.sum(pcnt[..., 0])
        return total / n_valid

    kernel = functools.partial(_ls_ce_loss_kernel, lb_pos=lb_pos, lb_neg=lb_neg,
                               ignore_index=ignore_index)
    loss_flat = pl.pallas_call(
        kernel,
        out_shape=jax.ShapeDtypeStruct((n, 1, hw), jnp.float32),
        grid_spec=pltpu.PrefetchScalarGridSpec(
            num_scalar_prefetch=0,
            grid=grid,
            in_specs=in_specs,
            out_specs=pl.BlockSpec((1, 1, t), lambda i, j: (i, 0, j)),
        ),
        compiler_params=compiler_params,
    )(x, y)
    return loss_flat.reshape(n, h, w)


def _reference(logits, label, lb_smooth=LB_SMOOTH, reduction="mean",
               ignore_index=IGNORE_INDEX):
    n, c, h, w = logits.shape
    ignore = label == ignore_index
    n_valid = jnp.sum(~ignore)
    lbl = jnp.where(ignore, 0, label)
    lb_pos, lb_neg = 1.0 - lb_smooth, lb_smooth / c
    onehot = jax.nn.one_hot(lbl, c, axis=1, dtype=jnp.float32)
    target = lb_neg * (1.0 - onehot) + lb_pos * onehot
    logs = jax.nn.log_softmax(logits.astype(jnp.float32), axis=1)
    loss = -jnp.sum(logs * target, axis=1)
    loss = jnp.where(ignore, 0.0, loss)
    if reduction == "mean":
        return jnp.sum(loss) / n_valid
    if reduction == "sum":
        return jnp.sum(loss)
    return loss


if __name__ == "__main__":
    key = jax.random.PRNGKey(0)
    k1, k2, k3 = jax.random.split(key, 3)

    N, C, H, W = 2, 32, 16, 16
    logits = jax.random.normal(k1, (N, C, H, W), dtype=jnp.float32)
    label = jax.random.randint(k2, (N, H, W), 0, C, dtype=jnp.int32)
    # sprinkle a few ignored positions
    drop = jax.random.bernoulli(k3, 0.15, (N, H, W))
    label = jnp.where(drop, IGNORE_INDEX, label)

    out_mean = jax.block_until_ready(label_smooth_ce(logits, label, reduction="mean"))
    out_sum = jax.block_until_ready(label_smooth_ce(logits, label, reduction="sum"))
    out_none = jax.block_until_ready(label_smooth_ce(logits, label, reduction="none"))

    ref_mean = _reference(logits, label, reduction="mean")
    ref_sum = _reference(logits, label, reduction="sum")
    ref_none = _reference(logits, label, reduction="none")
    assert jnp.allclose(out_mean, ref_mean, rtol=1e-4, atol=1e-4), (out_mean, ref_mean)
    assert jnp.allclose(out_sum, ref_sum, rtol=1e-4, atol=1e-3), (out_sum, ref_sum)
    assert jnp.allclose(out_none, ref_none, rtol=1e-4, atol=1e-4)

    # bf16 logits: halves HBM read traffic; kernel upcasts to f32 internally.
    logits_bf16 = logits.astype(jnp.bfloat16)
    out_bf16 = jax.block_until_ready(
        label_smooth_ce(logits_bf16, label, reduction="mean"))
    ref_bf16 = _reference(logits_bf16, label, reduction="mean")
    assert jnp.allclose(out_bf16, ref_bf16, rtol=1e-4, atol=1e-4), (out_bf16, ref_bf16)

    print("KERNEL_OK")
</pallas_src>

<mosaic_0001>
module attributes {stable_mosaic.version = 11 : i64} {
  func.func @_ls_ce_reduce_kernel(%arg0: i32, %arg1: i32, %arg2: memref<1x32x128xf32, #tpu.memory_space<vmem>>, %arg3: memref<1x1x128xi32, #tpu.memory_space<vmem>>, %arg4: memref<1x1x1x128xf32, #tpu.memory_space<vmem>>, %arg5: memref<1x1x1x128xf32, #tpu.memory_space<vmem>>) attributes {dimension_semantics = [#tpu.dimension_semantics<parallel>, #tpu.dimension_semantics<parallel>], iteration_bounds = array<i64: 2, 2>, scalar_prefetch = 0 : i64, scratch_operands = 0 : i64, tpu.core_type = #tpu.core_type<tc>, window_params = [{transform_indices = @transform_0, window_bounds = array<i64: 1, 32, 128>}, {transform_indices = @transform_1, window_bounds = array<i64: 1, 1, 128>}, {transform_indices = @transform_2, window_bounds = array<i64: 1, 1, 1, 128>}, {transform_indices = @transform_3, window_bounds = array<i64: 1, 1, 1, 128>}]} {
    %c0 = arith.constant 0 : index
    %c0_0 = arith.constant 0 : index
    %c0_1 = arith.constant 0 : index
    %0 = vector.load %arg2[%c0, %c0_0, %c0_1] : memref<1x32x128xf32, #tpu.memory_space<vmem>>, vector<1x32x128xf32>
    %1 = vector.shape_cast %0 : vector<1x32x128xf32> to vector<32x128xf32>
    %cst = arith.constant dense<0xFF800000> : vector<128xf32>
    %2 = vector.multi_reduction <maximumf>, %1, %cst [0] : vector<32x128xf32> to vector<128xf32>
    %3 = vector.shape_cast %2 : vector<128xf32> to vector<1x128xf32>
    %4 = vector.broadcast %3 : vector<1x128xf32> to vector<32x128xf32>
    %5 = arith.subf %1, %4 : vector<32x128xf32>
    %6 = math.exp %5 : vector<32x128xf32>
    %cst_2 = arith.constant 1.000000e+00 : f32
    %7 = vector.broadcast %cst_2 : f32 to vector<1x32xf32>
    %cst_3 = arith.constant dense<0.000000e+00> : vector<1x128xf32>
    %8 = tpu.matmul %7, %6, %cst_3 {dimension_numbers = #tpu.dot_dimension_numbers<[1], [0], [0], [1], [0, 0, 1, 1], [], []>} : vector<1x32xf32>, vector<32x128xf32>, vector<1x128xf32> -> vector<1x128xf32>
    %cst_4 = arith.constant dense<0.000000e+00> : vector<1x128xf32>
    %9 = tpu.matmul %7, %1, %cst_4 {dimension_numbers = #tpu.dot_dimension_numbers<[1], [0], [0], [1], [0, 0, 1, 1], [], []>} : vector<1x32xf32>, vector<32x128xf32>, vector<1x128xf32> -> vector<1x128xf32>
    %10 = math.log %8 : vector<1x128xf32>
    %c0_5 = arith.constant 0 : index
    %c0_6 = arith.constant 0 : index
    %c0_7 = arith.constant 0 : index
    %11 = vector.load %arg3[%c0_5, %c0_6, %c0_7] : memref<1x1x128xi32, #tpu.memory_space<vmem>>, vector<1x1x128xi32>
    %12 = vector.shape_cast %11 : vector<1x1x128xi32> to vector<1x128xi32>
    %c-100_i32 = arith.constant -100 : i32
    %13 = vector.broadcast %c-100_i32 : i32 to vector<1x128xi32>
    %14 = arith.cmpi eq, %12, %13 : vector<1x128xi32>
    %c0_i32 = arith.constant 0 : i32
    %15 = vector.broadcast %c0_i32 : i32 to vector<1x128xi32>
    %16 = arith.select %14, %15, %12 : vector<1x128xi1>, vector<1x128xi32>
    %17 = tpu.iota {dimensions = array<i32: 0>} : vector<32x1xi32>
    %18 = vector.broadcast %17 : vector<32x1xi32> to vector<32x128xi32>
    %19 = vector.broadcast %16 : vector<1x128xi32> to vector<32x128xi32>
    %20 = arith.cmpi eq, %18, %19 : vector<32x128xi32>
    %cst_8 = arith.constant 0.000000e+00 : f32
    %21 = vector.broadcast %cst_8 : f32 to vector<32x128xf32>
    %22 = arith.select %20, %1, %21 : vector<32x128xi1>, vector<32x128xf32>
    %cst_9 = arith.constant dense<0.000000e+00> : vector<128xf32>
    %23 = vector.multi_reduction <add>, %22, %cst_9 [0] : vector<32x128xf32> to vector<128xf32>
    %24 = vector.shape_cast %23 : vector<128xf32> to vector<1x128xf32>
    %cst_10 = arith.constant 3.200000e+01 : f32
    %25 = vector.broadcast %cst_10 : f32 to vector<1x128xf32>
    %26 = arith.mulf %25, %3 : vector<1x128xf32>
    %27 = arith.subf %9, %26 : vector<1x128xf32>
    %cst_11 = arith.constant 3.200000e+01 : f32
    %28 = vector.broadcast %cst_11 : f32 to vector<1x128xf32>
    %29 = arith.mulf %28, %10 : vector<1x128xf32>
    %30 = arith.subf %27, %29 : vector<1x128xf32>
    %cst_12 = arith.constant 3.125000e-03 : f32
    %31 = vector.broadcast %cst_12 : f32 to vector<1x128xf32>
    %32 = arith.mulf %31, %30 : vector<1x128xf32>
    %33 = arith.subf %24, %3 : vector<1x128xf32>
    %34 = arith.subf %33, %10 : vector<1x128xf32>
    %cst_13 = arith.constant 8.968750e-01 : f32
    %35 = vector.broadcast %cst_13 : f32 to vector<1x128xf32>
    %36 = arith.mulf %35, %34 : vector<1x128xf32>
    %37 = arith.addf %32, %36 : vector<1x128xf32>
    %cst_14 = arith.constant 0.000000e+00 : f32
    %38 = vector.broadcast %cst_14 : f32 to vector<1x128xf32>
    %39 = arith.subf %38, %37 : vector<1x128xf32>
    %cst_15 = arith.constant 0.000000e+00 : f32
    %40 = vector.broadcast %cst_15 : f32 to vector<1x128xf32>
    %41 = arith.select %14, %40, %39 : vector<1x128xi1>, vector<1x128xf32>
    %42 = tpu.iota {dimensions = array<i32: 1>} : vector<1x128xi32>
    %c128_i32 = arith.constant 128 : i32
    %43 = arith.muli %arg1, %c128_i32 : i32
    %c256_i32 = arith.constant 256 : i32
    %44 = arith.subi %c256_i32, %43 : i32
    %45 = vector.broadcast %44 : i32 to vector<1x128xi32>
    %46 = arith.cmpi slt, %42, %45 : vector<1x128xi32>
    %cst_16 = arith.constant dense<true> : vector<1x128xi1>
    %47 = arith.xori %14, %cst_16 : vector<1x128xi1>
    %48 = arith.andi %46, %47 : vector<1x128xi1>
    %cst_17 = arith.constant 0.000000e+00 : f32
    %49 = vector.broadcast %cst_17 : f32 to vector<1x128xf32>
    %50 = arith.select %48, %41, %49 : vector<1x128xi1>, vector<1x128xf32>
    %51 = vector.shape_cast %50 : vector<1x128xf32> to vector<1x1x128xf32>
    %cst_18 = arith.constant dense<0.000000e+00> : vector<1xf32>
    %52 = vector.multi_reduction <add>, %51, %cst_18 [1, 2] : vector<1x1x128xf32> to vector<1xf32>
    %53 = vector.shape_cast %52 : vector<1xf32> to vector<1x1x1xf32>
    %54 = vector.extract %53[0, 0, 0] : f32 from vector<1x1x1xf32>
    %55 = vector.broadcast %54 : f32 to vector<1x1x1x128xf32>
    %c0_19 = arith.constant 0 : index
    %c0_20 = arith.constant 0 : index
    %c0_21 = arith.constant 0 : index
    %c0_22 = arith.constant 0 : index
    %56 = vector.load %arg4[%c0_19, %c0_20, %c0_21, %c0_22] : memref<1x1x1x128xf32, #tpu.memory_space<vmem>>, vector<1x1x1x128xf32>
    tpu.vector_store %arg4[%c0_19, %c0_20, %c0_21, %c0_22], %55 {strides = array<i32>} : memref<1x1x1x128xf32, #tpu.memory_space<vmem>>, vector<1x1x1x128xf32>,
    %cst_23 = arith.constant 1.000000e+00 : f32
    %cst_24 = arith.constant 0.000000e+00 : f32
    %57 = vector.broadcast %cst_23 : f32 to vector<1x128xf32>
    %58 = vector.broadcast %cst_24 : f32 to vector<1x128xf32>
    %59 = arith.select %48, %57, %58 : vector<1x128xi1>, vector<1x128xf32>
    %60 = vector.shape_cast %59 : vector<1x128xf32> to vector<1x1x128xf32>
    %cst_25 = arith.constant dense<0.000000e+00> : vector<1xf32>
    %61 = vector.multi_reduction <add>, %60, %cst_25 [1, 2] : vector<1x1x128xf32> to vector<1xf32>
    %62 = vector.shape_cast %61 : vector<1xf32> to vector<1x1x1xf32>
    %63 = vector.extract %62[0, 0, 0] : f32 from vector<1x1x1xf32>
    %64 = vector.broadcast %63 : f32 to vector<1x1x1x128xf32>
    %c0_26 = arith.constant 0 : index
    %c0_27 = arith.constant 0 : index
    %c0_28 = arith.constant 0 : index
    %c0_29 = arith.constant 0 : index
    %65 = vector.load %arg5[%c0_26, %c0_27, %c0_28, %c0_29] : memref<1x1x1x128xf32, #tpu.memory_space<vmem>>, vector<1x1x1x128xf32>
    tpu.vector_store %arg5[%c0_26, %c0_27, %c0_28, %c0_29], %64 {strides = array<i32>} : memref<1x1x1x128xf32, #tpu.memory_space<vmem>>, vector<1x1x1x128xf32>,
    return
  }
  func.func @transform_0(%arg0: i32, %arg1: i32) -> (i32, i32, i32) {
    %c0_i32 = arith.constant 0 : i32
    %c0_i32_0 = arith.constant 0 : i32
    return %arg0, %c0_i32, %arg1 : i32, i32, i32
  }
  func.func @transform_1(%arg0: i32, %arg1: i32) -> (i32, i32, i32) {
    %c0_i32 = arith.constant 0 : i32
    %c0_i32_0 = arith.constant 0 : i32
    return %arg0, %c0_i32, %arg1 : i32, i32, i32
  }
  func.func @transform_2(%arg0: i32, %arg1: i32) -> (i32, i32, i32, i32) {
    %c0_i32 = arith.constant 0 : i32
    %c0_i32_0 = arith.constant 0 : i32
    %c0_i32_1 = arith.constant 0 : i32
    return %arg0, %arg1, %c0_i32, %c0_i32_0 : i32, i32, i32, i32
  }
  func.func @transform_3(%arg0: i32, %arg1: i32) -> (i32, i32, i32, i32) {
    %c0_i32 = arith.constant 0 : i32
    %c0_i32_0 = arith.constant 0 : i32
    %c0_i32_1 = arith.constant 0 : i32
    return %arg0, %arg1, %c0_i32, %c0_i32_0 : i32, i32, i32, i32
  }
}

</mosaic_0001>

<bundles_post_ra>
// kernel: tpu_custom_call.1
= control target key start
LH: loop header
LB: loop body
LE: loop exit
PB: predicated region body
PF: predicated region fallthrough
CT: control target
= control target key end

     0   :  { %s1105_s0 = inlined_call_operand.hbm [shape: f32[2,32,256], index: 0, kind: input, shape index: {}]   ;;  %s1106_s1 = inlined_call_operand.hbm [shape: s32[2,1,256], index: 1, kind: input, shape index: {}]   ;;  %s1107_s2 = inlined_call_operand.hbm [shape: f32[2,2,1,128], index: 2, kind: output, shape index: {0}]   ;;  %s1108_s3 = inlined_call_operand.hbm [shape: f32[2,2,1,128], index: 3, kind: output, shape index: {1}]  }
   0x1   :  { %1111 = sst [smem:[#allocation17_spill]] %s1105_s0 }
   0x2   :  { %9 = vsyncpa [#allocation3], 0 }
   0x3   :  { %11 = vsyncpa [#allocation3 + $0x1], 0 }
   0x4   :  { %12 = vsyncpa [#allocation6], 0 }
   0x5   :  { %14 = vsyncpa [#allocation6 + $0x1], 0 }
   0x6   :  { %15 = vsyncpa [#allocation4], 0 }
   0x7   :  { %17 = vsyncpa [#allocation4 + $0x1], 0 }
   0x8   :  { %18 = vsyncpa [#allocation9], 0 }
   0x9   :  { %20 = vsyncpa [#allocation9 + $0x1], 0  ;;  %s914_s12 = smov 0   ;;  %s916_s13 = smov 0  }
   0xa   :  { %s918_s14 = smov 0   ;;  %s920_s15 = smov 0  }
   0xb   :  { %s922_s16 = smov 0   ;;  %s924_s17 = smov 0  }
   0xc   :  { %s926_s18 = smov 0   ;;  %s928_s19 = smov 0  }
   0xd LB: > { %s567_s20 = sadd.s32 4294967295, %s886_s19   ;;  %s568_s21 = sadd.s32 4294967294, %s886_s19   ;;  %s886_s19 = sphi %s928_s19, %s26_s19   ;;  %s882_s18 = sphi %s926_s18, %s1130_s18   ;;  %s878_s17 = sphi %s924_s17, %s1129_s17   ;;  %s874_s16 = sphi %s922_s16, %s1128_s16   ;;  %s870_s15 = sphi %s920_s15, %s1127_s15   ;;  %s866_s14 = sphi %s918_s14, %s1126_s14   ;;  %s862_s13 = sphi %s916_s13, %s1125_s13   ;;  %s858_s12 = sphi %s914_s12, %s1124_s12  }
   0xe   : > { %s35_s22 = sadd.s32 1, %s878_s17  ;;  %s38_s23 = sadd.s32 1, %s882_s18 }
   0xf   : > { %p36_p0 = scmp.ge.s32.totalorder %s35_s22, 2  ;;  %s47_s24 = sadd.s32 1, %s866_s14 }
  0x10   : > { %p54_p1 = scmp.ne.s32.totalorder %s866_s14, %s862_s13  ;;  %p55_p2 = scmp.eq.s32.totalorder %s886_s19, 0 }
  0x11   : > { %s1132_s22 = smov (%p36_p0, %s35_s22), 0  ;;  %s1134_s23 = smov (!%p36_p0, %s38_s23), %s882_s18 }
  0x12   : > { %1112 = sst [smem:[#allocation14_spill]] %s1132_s22  ;;  %s43_s25 = ssub.s32 %s878_s17, %s1132_s22 }
  0x13   : > { %p967_p3 = por %p55_p2, %p54_p1  ;;  %p40_p4 = scmp.ge.s32.totalorder %s1134_s23, 2 }
  0x14   : > { %p60_p5 = scmp.ne.s32.totalorder %s862_s13, %s858_s12  ;;  %p61_p6 = scmp.eq.s32.totalorder %s567_s20, 0 }
  0x15   : > { %p114_p7 = scmp.eq.s32.totalorder %s567_s20, 3  ;;  %s1136_s23 = smov (%p40_p4, %s1134_s23), 0 }
  0x16   : > { %1114 = sst [smem:[#allocation15_spill]] %s1136_s23  ;;  %p975_p8 = por %p61_p6, %p60_p5 }
  0x17   : > { %p979_p9 = por %p114_p7, %p54_p1  ;;  %s42_s29 = ssub.s32 %s882_s18, %s1136_s23 }
  0x18   : > { %p120_p10 = scmp.eq.s32.totalorder %s568_s21, 3  ;;  %s44_s30 = sor.u32 %s43_s25, %s42_s29 }
  0x19   : > { %p45_p11 = scmp.eq.s32.totalorder %s44_s30, 0  ;;  %p610_p13 = scmp.lt.s32.totalorder %s886_s19, 4 }
  0x1a   : > { %p985_p12 = por %p120_p10, %p60_p5  ;;  %s991_s5 = sand.u32 1, %s866_s14  }
  0x1b   : > { %s994_s6 = scalar_select %p45_p11, %s866_s14, %s47_s24  }
  0x1c   : > { %s571_s7 = sshll.u32 %s991_s5, 5  ;;  %s572_s8 = sshll.u32 %s882_s18, 3 }
  0x1d   : > { %1118 = sst [smem:[#allocation16_spill]] %s994_s6  ;;  %s176_s9 = sadd.s32 %s878_s17, %s572_s8 }
  0x1e   : > { %s172_s10 = scalar_lea.vmem [#allocation2], %s571_s7  ;;  %s573_s20 = sshll.u32 %s176_s9, 3 }
  0x1f   : > { %s181_s11 = sshll.u32 %s172_s10, 4  ;;  %s1119_s0 = sld [smem:[#allocation17_spill]]  ;;  %s182_s11 = int_to_ptr.vmem [resolvable:$true] %s181_s11 }
  0x20   : > { %p1004_p0 = pnand %p610_p13, %p967_p3  ;;  %s169_s8 = scalar_lea.sflag [#allocation3], %s991_s5 }
  0x21   : > { %s888_s7 = smov 256   ;;  %s889_s10 = smov 128  }
  0x22   : > { %s890_s9 = smov 8   ;;  %p575_p1 = scmp.ge.s32.totalorder %s886_s19, 1 }
  0x23   : > { %p208_p2 = scmp.lt.s32.totalorder %s886_s19, 5  ;;  %s194_s21 = scalar_lea.vmem [#allocation5], %s991_s5 }
  0x24   : > { %s203_s25 = sshll.u32 %s194_s21, 4  ;;  %s192_s6 = scalar_lea.sflag [#allocation6], %s991_s5  ;;  %s204_s25 = int_to_ptr.vmem [resolvable:$true] %s203_s25 }
  0x25   : > { %s178_s29 = scalar_lea.hbm %s1119_s0, %s573_s20  ;;  %p209_p4 = pnand %p575_p1, %p208_p2 }
  0x26   : > { %s179_s30 = sshll.u32 %s178_s29, 4  ;;  %s574_s20 = sshll.u32 %s882_s18, 1  ;;  %s180_s30 = int_to_ptr.hbm [resolvable:$true] %s179_s30 }
  0x27   : > { %599 = dma.hbm_to_vmem [thread:$0]  (!%p1004_p0), %s180_s30, 512, %s182_s11, %s169_s8, %s888_s7, %s889_s10, %s890_s9  }
  0x28   : > { %s198_s26 = sadd.s32 %s878_s17, %s574_s20  ;;  %212 = sbr.rel (%p209_p4) target bundleno = 428 (0x1ac), region = 28 }
  0x29   : > { %s199_s29 = scalar_lea.hbm %s1106_s1, %s198_s26  ;;  %s1023_s11 = sand.u32 (!%p209_p4), 1, %s862_s13  }
  0x2a   : > { %s201_s22 = sshll.u32 %s199_s29, 4  ;;  %s576_s30 = sshll.u32 (!%p209_p4), %s1023_s11, 5  ;;  %s202_s22 = int_to_ptr.hbm [resolvable:$true] %s201_s22 }
  0x2b   : > { %602 = dma.hbm_to_vmem [thread:$0]  (!%p1004_p0), %s202_s22, 16, %s204_s25, %s192_s6  }
  0x2c   : > { %s215_s8 = scalar_lea.sflag (!%p209_p4), [#allocation3], %s1023_s11  ;;  %s218_s7 = scalar_lea.vmem (!%p209_p4), [#allocation2], %s576_s30 }
  0x2d   : > { %841 = dma.done.wait (%p975_p8), %s215_s8, 512  }
  0x2e   : > { %843 = vsyncadd (%p975_p8), %s215_s8, 4294966784  ;;  %s225_s0 = scalar_lea.sflag [#allocation6], %s1023_s11  ;;  %s227_s22 = scalar_lea.vmem [#allocation5], %s1023_s11 }
  0x2f   : > { %845 = dma.done.wait (%p975_p8), %s225_s0, 16  }
  0x30   : > { %847 = vsyncadd (%p975_p8), %s225_s0, 4294967280  ;;  %v258_v0 = vld [vmem:[%s218_s7] sm:$0xff]  ;;  %v259_v1 = vld [vmem:[%s218_s7 + $0x8] sm:$0xff]  ;;  %vm283_vm0 = vcmask 261120   ;;  %v891_v9 = vmov 1.0   ;;  %v332_v27 = vlaneseq  ;;  %s579_s23 = sshll.u32 %s870_s15, 7 }
  0x31   : > { %v260_v2 = vld [vmem:[%s218_s7 + $0x10] sm:$0xff]  ;;  %v261_v3 = vld [vmem:[%s218_s7 + $0x18] sm:$0xff]  ;;  %v262_v4 = vmax.f32 %v258_v0, %v259_v1  ;;  %v329_v26 = vld [vmem:[%s227_s22] sm:$0x1]  ;;  %s369_s27 = ssub.s32 256, %s579_s23  ;;  %vm892_vm7 = vmmov 1  }
  0x32   : > { %v263_v5 = vmax.f32 %v260_v2, %v261_v3  ;;  %319 = vmatpush.msra.mxu1 %v261_v3  ;;  %vm330_vm1 = vcmp.eq.s32.totalorder %v329_v26, 4294967196  ;;  %v333_v28 = vshrl.u32 %v332_v27, 7  ;;  %v367_v56 = vand.u32 127, %v332_v27  ;;  %s580_s5 = sshll.u32 %s874_s16, 1  ;;  %s251_s20 = scalar_lea.vmem [#allocation7], %s1023_s11 }
  0x33   : > { %v331_v29 = vsel %vm330_vm1, 0, %v329_v26  ;;  %v370_v58 = vstv %s369_s27  ;;  %vm372_vm8 = vmxor %vm330_vm1, %vm892_vm7  ;;  %vm375_vm10 = vcmask 1040384   ;;  %s415_s6 = sadd.s32 %s870_s15, %s580_s5  ;;  %s418_s26 = sshll.u32 %s251_s20, 4  ;;  %s419_s26 = int_to_ptr.vmem [resolvable:$true] %s418_s26 }
  0x34   : > { %v264_v6 = vmax.f32 %v262_v4, %v263_v5  ;;  %320 = vmatpush.msra.mxu1 %v260_v2  ;;  %v334_v30 = vadd.s32 8, %v333_v28  ;;  %v337_v31 = vperm.slane %v331_v29, 0  ;;  %v335_v32 = vadd.s32 16, %v333_v28  ;;  %s416_s9 = scalar_lea.hbm %s1107_s2, %s415_s6  ;;  %s431_s8 = scalar_lea.hbm %s1108_s3, %s415_s6 }
  0x35   : > { %v336_v35 = vadd.s32 24, %v333_v28  ;;  %vm371_vm6 = vcmp.lt.s32.totalorder %v367_v56, %v370_v58  ;;  %s420_s21 = sshll.u32 %s416_s9, 4  ;;  %s402_s7 = scalar_lea.sflag [#allocation4], %s1023_s11  ;;  %s421_s21 = int_to_ptr.hbm [resolvable:$true] %s420_s21 }
  0x36   : > { %v265_v7 = vrot.slane %v264_v6, 4  ;;  %321 = vmatpush.msra.mxu1 %v259_v1  ;;  %vm338_vm2 = vcmp.eq.s32.totalorder %v333_v28, %v337_v31  ;;  %vm339_vm3 = vcmp.eq.s32.totalorder %v334_v30, %v337_v31  ;;  %vm340_vm4 = vcmp.eq.s32.totalorder %v335_v32, %v337_v31  ;;  %vm373_vm9 = vmand %vm371_vm6, %vm372_vm8  ;;  %s766_s16 = sshra.s32 %s421_s21, 4  ;;  %s772_s23 = scalar_lea.hbm %s1107_s2, 4  ;;  %s767_s16 = int_to_ptr.hbm [resolvable:$true] %s766_s16 }
  0x37   : > { %v342_v33 = vsel %vm338_vm2, %v258_v0, 0.0  ;;  %v343_v34 = vsel %vm339_vm3, %v259_v1, 0.0  ;;  %v344_v37 = vsel %vm340_vm4, %v260_v2, 0.0  ;;  %vm341_vm5 = vcmp.eq.s32.totalorder %v336_v35, %v337_v31  ;;  %s768_s15 = scalar_lea.hbm %s767_s16, 1  ;;  %p773_p7 = scmp.lt.s32.totalorder %s767_s16, %s1107_s2 }
  0x38   : > { %v266_v8 = vmax.f32 %v264_v6, %v265_v7  ;;  %322 = vmatpush.msra.mxu1 %v258_v0  ;;  %v346_v36 = vadd.f32 %v343_v34, %v342_v33  ;;  %v345_v39 = vsel %vm341_vm5, %v261_v3, 0.0  ;;  %p769_p3 = scmp.ne.s32.totalorder %s767_s16, %s768_s15  ;;  %p774_p8 = scmp.lt.s32.totalorder %s772_s23, %s768_s15 }
  0x39   : > { %578 = vmatmul.msk.f32.vlgmr.msra.gmra.mxu1 %vm283_vm0, %v891_v9 }
  0x3a   : > { %v267_v10 = vrot.slane %v266_v8, 2  ;;  %v347_v38 = vadd.f32 %v346_v36, %v344_v37  ;;  %p770_p5 = pnand %p769_p3, %p979_p9  ;;  %p775_p10 = por %p774_p8, %p773_p7 }
  0x3c   : > { %v268_v11 = vmax.f32 %v266_v8, %v267_v10  ;;  %v348_v40 = vadd.f32 %v347_v38, %v345_v39  ;;  %p771_p6 = pneg %p770_p5 }
  0x3e   : > { %v269_v12 = vrot.slane %v268_v11, 1  ;;  %v349_v41 = vrot.slane %v348_v40, 4  ;;  %p776_p11 = pnand %p775_p10, %p771_p6 }
  0x40   : > { %v270_v13 = vmax.f32 %v268_v11, %v269_v12  ;;  %v350_v42 = vadd.f32 %v349_v41, %v348_v40 }
  0x42   : > { %v274_v14 = vsub.f32 %v261_v3, %v270_v13  ;;  %v273_v15 = vsub.f32 %v260_v2, %v270_v13  ;;  %v272_v16 = vsub.f32 %v259_v1, %v270_v13  ;;  %v271_v17 = vsub.f32 %v258_v0, %v270_v13 }
  0x43   : > { %v351_v43 = vrot.slane %v350_v42, 2  ;;  %v355_v48 = vmul.f32 32.0, %v270_v13  ;;  %v893_v2 = vmov 0.0  }
  0x44   : > { %v281_v18 = vmul.f32 1.442695, %v274_v14  ;;  %v279_v19 = vmul.f32 1.442695, %v273_v15  ;;  %v277_v20 = vmul.f32 1.442695, %v272_v16 }
  0x45   : > { %v275_v21 = vmul.f32 1.442695, %v271_v17  ;;  %v352_v44 = vadd.f32 %v351_v43, %v350_v42  ;;  %v388_v3 = vsel %vm373_vm9, 1.0, %v893_v2 }
  0x46   : > { %682 = vpow2.f32 %v281_v18  ;;  %v389_v4 = vsel %vm375_vm10, %v388_v3, 0.0 }
  0x47   : > { %684 = vpow2.f32 %v279_v19  ;;  %v353_v45 = vrot.slane %v352_v44, 1 }
  0x48   : > { %686 = vpow2.f32 %v277_v20 }
  0x49   : > { %688 = vpow2.f32 %v275_v21  ;;  %v354_v47 = vadd.f32 %v353_v45, %v352_v44 }
  0x4b   : > { %v360_v50 = vsub.f32 %v354_v47, %v270_v13 }
  0x4c   : > { %v683_v22 = vpop.eup %682 }
  0x4d   : > { %v685_v23 = vpop.eup %684  ;;  %299 = vmatpush.msra.mxu0 %v683_v22 }
  0x4e   : > { %v687_v24 = vpop.eup %686 }
  0x4f   : > { %300 = vmatpush.msra.mxu0 %v685_v23  ;;  %v689_v25 = vpop.eup %688 }
  0x51   : > { %301 = vmatpush.msra.mxu0 %v687_v24 }
  0x53   : > { %302 = vmatpush.msra.mxu0 %v689_v25 }
  0x54   : > { %577 = vmatmul.msk.f32.vlgmr.msra.gmra.mxu0 %vm283_vm0, %v891_v9 }
  0xb6   : > { %v324_v49 = vpop.f32.mrf.mxu1 }
  0xb7   : > { %v356_v53 = vsub.f32 %v324_v49, %v355_v48 }
  0xd1   : > { %v304_v46 = vpop.f32.mrf.mxu0 }
  0xd2   : > { %690 = vlog2.f32 %v304_v46 }
  0xd8   : > { %v691_v51 = vpop.eup %690 }
  0xd9   : > { %v328_v52 = vmul.f32 0.6931472, %v691_v51 }
  0xdb   : > { %v357_v54 = vmul.f32 32.0, %v328_v52  ;;  %v361_v55 = vsub.f32 %v360_v50, %v328_v52 }
  0xdd   : > { %v358_v57 = vsub.f32 %v356_v53, %v357_v54  ;;  %v362_v59 = vmul.f32 0.896875, %v361_v55 }
  0xdf   : > { %v359_v60 = vmul.f32 0.003125, %v358_v57 }
  0xe1   : > { %v363_v61 = vadd.f32 %v362_v59, %v359_v60 }
  0xe3   : > { %v364_v62 = vsub.f32 0.0, %v363_v61 }
  0xe5   : > { %v365_v63 = vsel %vm330_vm1, 0.0, %v364_v62 }
  0xe6   : > { %v374_v0 = vsel %vm373_vm9, %v365_v63, 0.0 }
  0xe7   : > { %v376_v1 = vsel %vm375_vm10, %v374_v0, 0.0 }
  0xe8   : > { %377 = vadd.xlane.f32.xlu0 %v376_v1 }
  0xf0   : > { %390 = vadd.xlane.f32.xlu0 %v389_v4 }
 0x15b   : > { %v378_v5 = vpop.xlane.xlu0 %377 }
 0x15c   : > { %v379_v6 = vrot.slane %v378_v5, 4 }
 0x15e   : > { %v380_v7 = vadd.f32 %v379_v6, %v378_v5 }
 0x160   : > { %v381_v8 = vrot.slane %v380_v7, 2 }
 0x162   : > { %v382_v9 = vadd.f32 %v381_v8, %v380_v7 }
 0x163   : > { %v391_v10 = vpop.xlane.xlu0 %390 }
 0x164   : > { %v392_v11 = vrot.slane %v391_v10, 4  ;;  %v383_v12 = vrot.slane %v382_v9, 1 }
 0x166   : > { %v393_v13 = vadd.f32 %v392_v11, %v391_v10  ;;  %v384_v14 = vadd.f32 %v383_v12, %v382_v9 }
 0x168   : > { %v394_v15 = vrot.slane %v393_v13, 2  ;;  %584 = vpush %v384_v14 }
 0x16a   : > { %v395_v16 = vadd.f32 %v394_v15, %v393_v13 }
 0x16c   : > { %v396_v17 = vrot.slane %v395_v16, 1 }
 0x16e   : > { %v397_v18 = vadd.f32 %v396_v17, %v395_v16 }
 0x170   : > { %586 = vpush %v397_v18 }
 0x199   : > { %s585_s25 = spop %584 }
 0x19a   : > { %v386_v19 = vstv %s585_s25 }
 0x19b   : > { %387 = vst [vmem:[%s251_s20] sm:$0x1] %v386_v19 }
 0x19c   : > { %779 = shalt.err (!%p776_p11)
}
 0x19d   : > { %592 = dma.vmem_to_hbm [thread:$0]  (%p979_p9), %s419_s26, 16, %s421_s21, %s402_s7  }
 0x19e   : > { %s257_s6 = scalar_lea.vmem [#allocation8], %s1023_s11  ;;  %s435_s10 = sshll.u32 %s431_s8, 4  ;;  %s436_s10 = int_to_ptr.hbm [resolvable:$true] %s435_s10 }
 0x19f   : > { %s433_s24 = sshll.u32 %s257_s6, 4  ;;  %s406_s20 = scalar_lea.sflag [#allocation9], %s1023_s11  ;;  %s434_s24 = int_to_ptr.vmem [resolvable:$true] %s433_s24 }
 0x1a0   : > { %s794_s25 = sshra.s32 %s436_s10, 4  ;;  %s800_s26 = scalar_lea.hbm %s1108_s3, 4  ;;  %s795_s25 = int_to_ptr.hbm [resolvable:$true] %s794_s25 }
 0x1a1   : > { %s587_s9 = spop %586  ;;  %s796_s29 = scalar_lea.hbm %s795_s25, 1 }
 0x1a2   : > { %v399_v20 = vstv %s587_s9  ;;  %p797_p13 = scmp.ne.s32.totalorder %s795_s25, %s796_s29  ;;  %p801_p2 = scmp.lt.s32.totalorder %s795_s25, %s1108_s3 }
 0x1a3   : > { %400 = vst [vmem:[%s257_s6] sm:$0x1] %v399_v20  ;;  %p802_p4 = scmp.lt.s32.totalorder %s800_s26, %s796_s29 }
 0x1a4   : > { %p798_p0 = pnand %p797_p13, %p979_p9 }
 0x1a5   : > { %p803_p3 = por %p802_p4, %p801_p2 }
 0x1a6   : > { %p799_p1 = pneg %p798_p0 }
 0x1a8   : > { %p804_p5 = pnand %p803_p3, %p799_p1 }
 0x1aa   : > { %807 = shalt.err (!%p804_p5)
}
 0x1ab   : > { %593 = dma.vmem_to_hbm [thread:$0]  (%p979_p9), %s434_s24, 16, %s436_s10, %s406_s20  }
 0x1ac PF: > { %p611_p6 = scmp.ge.s32.totalorder %s886_s19, 2  ;;  %s447_s11 = sand.u32 1, %s858_s12  }
 0x1ad   : > { %s448_s8 = scalar_lea.sflag [#allocation4], %s447_s11 }
 0x1ae   : > { %p604_p7 = pnand %p611_p6, %p985_p12 }
 0x1b0   : > { %p605_p8 = pneg %p604_p7 }
 0x1b2   : > { %849 = dma.done.wait (%p605_p8), %s448_s8, 16  }
 0x1b3   : > { %851 = vsyncadd (%p605_p8), %s448_s8, 4294967280  ;;  %s457_s15 = scalar_lea.sflag [#allocation9], %s447_s11 }
 0x1b4   : > { %853 = dma.done.wait (%p605_p8), %s457_s15, 16  }
 0x1b5   : > { %855 = vsyncadd (%p605_p8), %s457_s15, 4294967280  ;;  %s26_s19 = sadd.s32 1, %s886_s19   ;;  %s1121_s28 = sld [smem:[#allocation16_spill]] }
 0x1b6   : > { %p23_p10 = scmp.ge.s32.totalorder %s26_s19, 6   ;;  %s1122_s0 = sld [smem:[#allocation14_spill]] }
 0x1b7   : > { %s1123_s22 = sld [smem:[#allocation15_spill]]  ;;  %s1124_s12 = smov %s862_s13 }
 0x1b8   : > { %s1125_s13 = smov %s866_s14  ;;  %s1127_s15 = smov %s878_s17 }
 0x1b9   : > { %s1128_s16 = smov %s882_s18  ;;  %25 = sbr.rel (!%p23_p10) target bundleno = 13 (0xd), region = 103 }
 0x1bb   : > { %s1126_s14 = smov %s1121_s28 }
 0x1bc   : > { %s1129_s17 = smov %s1122_s0 }
 0x1bd   : > { %s1130_s18 = smov %s1123_s22 }
 0x1be   :  { %462 = vsyncpa [#allocation3], 1 }
 0x1bf   :  { %464 = vsyncpa [#allocation3 + $0x1], 1 }
 0x1c0   :  { %465 = vsyncpa [#allocation6], 1 }
 0x1c1   :  { %467 = vsyncpa [#allocation6 + $0x1], 1 }
 0x1c2   :  { %468 = vsyncpa [#allocation4], 1 }
 0x1c3   :  { %470 = vsyncpa [#allocation4 + $0x1], 1 }
 0x1c4   :  { %471 = vsyncpa [#allocation9], 1 }
 0x1c5   :  { %473 = vsyncpa [#allocation9 + $0x1], 1 }

</bundles_post_ra>
